<compile_context>
chip_gen: v5e
topology: v5e:2x2
jax: 0.10.0
libtpu: 0.0.40
codegen_flags: <defaults>
</compile_context>

<pallas_src>
import jax
import jax.numpy as jnp
import numpy as np
from jax.experimental import pallas as pl
from jax.experimental.pallas import tpu as pltpu


def _round_up(x, m):
    return (x + m - 1) // m * m


def _erf(x):
    # Abramowitz & Stegun 7.1.26 rational approximation, |abs err| <= 1.5e-7,
    # built only from exp / mul / add / reciprocal / abs / select so it lowers
    # cleanly on every TPU generation.  The reciprocal and exp both run on the
    # EUP slot, keeping the VALU free for the surrounding bias/GELU math.
    a1, a2, a3, a4, a5 = (0.254829592, -0.284496736, 1.421413741,
                          -1.453152027, 1.061405429)
    p = 0.3275911
    sgn = jnp.where(x < 0.0, -1.0, 1.0).astype(x.dtype)
    ax = jnp.abs(x)
    t = pl.reciprocal(1.0 + p * ax, approx=True)
    poly = t * (a1 + t * (a2 + t * (a3 + t * (a4 + t * a5))))
    return sgn * (1.0 - poly * jnp.exp(-ax * ax))


def _gelu_exact(x):
    # torch.nn.GELU() default is the exact (erf-based) GELU, not the tanh approx.
    return 0.5 * x * (1.0 + _erf(x * 0.7071067811865476))


def _make_ffn_kernel(matmul_dtype):
    def kernel(x_ref, w1_ref, b1_ref, w2_ref, b2_ref, o_ref, acc_ref):
        j = pl.program_id(1)                      # hidden-axis (reduction) step

        @pl.when(j == 0)
        def _init():
            acc_ref[...] = jnp.zeros_like(acc_ref)

        # Linear 1 on this hidden chunk: MXU matmul, f32 accumulation, f32 bias.
        # TODO(synk): plumb precision=HIGHEST here if bit-exact f32 matmul
        # semantics are ever required (bf16-operand default makes it moot).
        h = jnp.dot(x_ref[...], w1_ref[...],
                    preferred_element_type=jnp.float32) + b1_ref[...]
        # Exact (erf) GELU in f32.  Dropout(p=0.0) layers are identities.
        h = _gelu_exact(h)
        # Linear 2: accumulate this hidden chunk's contribution into f32 scratch.
        acc_ref[...] += jnp.dot(h.astype(matmul_dtype), w2_ref[...],
                                preferred_element_type=jnp.float32)

        @pl.when(j == pl.num_programs(1) - 1)
        def _finalize():
            o_ref[...] = (acc_ref[...] + b2_ref[...]).astype(o_ref.dtype)

    return kernel


def _pick_tm(M, block_rows):
    """Row-tile size: a multiple of 8 dividing round_up(M, 8), as large as
    possible (amortizes the ~0.35us per-grid-step overhead), but preferring
    >=2 grid steps when the tile can stay >=128 rows so v7x's two TensorCores
    both get work via the "parallel" row axis."""
    Mp = _round_up(max(M, 1), 8)
    cap = max(8, min(block_rows, Mp))
    divs = [t for t in range(8, cap + 1, 8) if Mp % t == 0]
    if not divs:
        return Mp, Mp
    multi = [t for t in divs if Mp // t >= 2 and t >= 128]
    tm = max(multi) if multi else max(divs)
    return tm, Mp


def _pick_th(H, h_block):
    """Hidden-axis tile: largest multiple of 128 dividing H, capped at h_block
    (bounds resident w1/w2 chunks and the (tm, tH) f32 intermediate); falls
    back to the full H when no such divisor exists."""
    best = None
    t = 128
    cap = min(H, max(h_block, 128))
    while t <= cap:
        if H % t == 0:
            best = t
        t += 128
    return best if best is not None else H


def _vmem_limit_bytes(tm, D, tH, mm_isize, out_isize):
    est = (2 * tm * D * mm_isize        # x tile (double-buffered)
           + 2 * D * tH * mm_isize      # w1 chunk
           + 2 * tH * 4                 # b1 chunk
           + 2 * tH * D * mm_isize      # w2 chunk
           + 2 * D * 4                  # b2
           + 2 * tm * D * out_isize     # output tile
           + tm * D * 4                 # f32 accumulator scratch
           + 2 * tm * tH * 4)           # (tm, tH) f32 intermediate headroom
    # 2x safety factor + 4 MiB headroom; never below the 32 MiB default of
    # v6e/v7x, never above 48 MiB (stays under v7x's 64 MiB physical VMEM).
    return int(min(max(2 * est + (4 << 20), 32 << 20), 48 << 20))


def feed_forward(x, w1, b1, w2, b2, *, block_rows=512, h_block=512,
                 matmul_dtype=jnp.bfloat16, out_dtype=None):
    """y = Linear2(GELU(Linear1(x)))  (Dropout(p=0) layers are identities).

    x: (..., dim); w1: (dim, hidden); b1: (hidden,); w2: (hidden, dim); b2: (dim,)
    """
    orig_shape = x.shape
    D = orig_shape[-1]
    H = w1.shape[1]
    assert w1.shape == (D, H) and w2.shape == (H, D)
    assert b1.shape[-1] == H and b2.shape[-1] == D
    if out_dtype is None:
        out_dtype = x.dtype
    mm_dtype = np.dtype(matmul_dtype)

    # Fold batch+seq into one lane-dense (M, D) slab, cast ONCE to the MXU
    # operand dtype (bf16 by default).
    xm = x.reshape(-1, D).astype(mm_dtype)
    M = xm.shape[0]
    tm, Mp = _pick_tm(M, block_rows)
    if Mp != M:
        # Alignment-only pad (< 8 rows); tm is derived from M so there is no
        # pad-to-fixed-tile round trip.
        xm = jnp.pad(xm, ((0, Mp - M), (0, 0)))
    tH = _pick_th(H, h_block)
    nh = H // tH

    w1c = w1.astype(mm_dtype)                      # cast once, halves weight DMA
    w2c = w2.astype(mm_dtype)
    b1r = b1.reshape(1, H).astype(jnp.float32)     # biases stay f32
    b2r = b2.reshape(1, D).astype(jnp.float32)

    vmem_limit = _vmem_limit_bytes(tm, D, tH, mm_dtype.itemsize,
                                   np.dtype(out_dtype).itemsize)

    out = pl.pallas_call(
        _make_ffn_kernel(mm_dtype),
        out_shape=jax.ShapeDtypeStruct((Mp, D), out_dtype),
        grid=(Mp // tm, nh),                               # reduction axis last
        in_specs=[
            pl.BlockSpec((tm, D), lambda i, j: (i, 0)),    # x: invariant over j
            pl.BlockSpec((D, tH), lambda i, j: (0, j)),    # w1 hidden chunk
            pl.BlockSpec((1, tH), lambda i, j: (0, j)),    # b1 hidden chunk
            pl.BlockSpec((tH, D), lambda i, j: (j, 0)),    # w2 hidden chunk
            pl.BlockSpec((1, D), lambda i, j: (0, 0)),     # b2: fully invariant
        ],
        out_specs=pl.BlockSpec((tm, D), lambda i, j: (i, 0)),
        scratch_shapes=[pltpu.VMEM((tm, D), jnp.float32)],  # f32 accumulator
        compiler_params=pltpu.CompilerParams(
            dimension_semantics=("parallel", "arbitrary"),
            vmem_limit_bytes=vmem_limit),
    )(xm, w1c, b1r, w2c, b2r)

    if Mp != M:
        out = out[:M]
    return out.reshape(orig_shape)


def feed_forward_ref(x, w1, b1, w2, b2):
    h = x @ w1 + b1
    h = 0.5 * h * (1.0 + jax.lax.erf(h * 0.7071067811865476))   # exact GELU
    return h @ w2 + b2


if __name__ == "__main__":
    # Small shapes consistent with the module (dim/hidden lane-dense).
    batch, seq, dim, hidden_dim = 2, 16, 128, 256

    key = jax.random.PRNGKey(0)
    kx, k1, k2, k3, k4 = jax.random.split(key, 5)
    x = jax.random.normal(kx, (batch, seq, dim), jnp.float32)
    w1 = 0.02 * jax.random.normal(k1, (dim, hidden_dim), jnp.float32)
    b1 = 0.02 * jax.random.normal(k2, (hidden_dim,), jnp.float32)
    w2 = 0.02 * jax.random.normal(k3, (hidden_dim, dim), jnp.float32)
    b2 = 0.02 * jax.random.normal(k4, (dim,), jnp.float32)

    ref = feed_forward_ref(x, w1, b1, w2, b2)

    # Default path: bf16 MXU operands, f32 accumulation, output in x.dtype.
    out = jax.block_until_ready(feed_forward(x, w1, b1, w2, b2))
    assert out.shape == x.shape and out.dtype == x.dtype
    assert jnp.allclose(out, ref, rtol=2e-2, atol=5e-3), (
        "bf16 path mismatch, max abs err = "
        f"{float(jnp.max(jnp.abs(out - ref)))}")

    # f32-operand fallback (kept for callers needing tighter matmul accuracy).
    out_f32 = jax.block_until_ready(
        feed_forward(x, w1, b1, w2, b2, matmul_dtype=jnp.float32))
    assert jnp.allclose(out_f32, ref, rtol=2e-2, atol=5e-3), (
        "f32 path mismatch, max abs err = "
        f"{float(jnp.max(jnp.abs(out_f32 - ref)))}")

    # Ragged rows (M not a multiple of the tile): exercises the derived-tm /
    # alignment-pad path.
    xr = x[:, :9, :]
    ref_r = feed_forward_ref(xr, w1, b1, w2, b2)
    out_r = jax.block_until_ready(feed_forward(xr, w1, b1, w2, b2))
    assert out_r.shape == xr.shape
    assert jnp.allclose(out_r, ref_r, rtol=2e-2, atol=5e-3), (
        "ragged path mismatch, max abs err = "
        f"{float(jnp.max(jnp.abs(out_r - ref_r)))}")

    print("KERNEL_OK")
</pallas_src>

<mosaic_0001>
module attributes {stable_mosaic.version = 11 : i64} {
  func.func @kernel(%arg0: i32, %arg1: i32, %arg2: memref<32x128xbf16, #tpu.memory_space<vmem>>, %arg3: memref<128x256xbf16, #tpu.memory_space<vmem>>, %arg4: memref<1x256xf32, #tpu.memory_space<vmem>>, %arg5: memref<256x128xbf16, #tpu.memory_space<vmem>>, %arg6: memref<1x128xf32, #tpu.memory_space<vmem>>, %arg7: memref<32x128xf32, #tpu.memory_space<vmem>>, %arg8: memref<32x128xf32, #tpu.memory_space<vmem>>) attributes {dimension_semantics = [#tpu.dimension_semantics<parallel>, #tpu.dimension_semantics<arbitrary>], iteration_bounds = array<i64: 1, 1>, scalar_prefetch = 0 : i64, scratch_operands = 1 : i64, tpu.core_type = #tpu.core_type<tc>, window_params = [{transform_indices = @transform_0, window_bounds = array<i64: 32, 128>}, {transform_indices = @transform_1, window_bounds = array<i64: 128, 256>}, {transform_indices = @transform_2, window_bounds = array<i64: 1, 256>}, {transform_indices = @transform_3, window_bounds = array<i64: 256, 128>}, {pipeline_mode = #tpu.pipeline_mode<synchronous>, transform_indices = @transform_4, window_bounds = array<i64: 1, 128>}, {transform_indices = @transform_5, window_bounds = array<i64: 32, 128>}]} {
    %c0_i32 = arith.constant 0 : i32
    %0 = arith.cmpi eq, %arg1, %c0_i32 : i32
    %1 = arith.extui %0 : i1 to i32
    %c0_i32_0 = arith.constant 0 : i32
    %2 = arith.cmpi ne, %1, %c0_i32_0 : i32
    scf.if %2 {
      %cst_30 = arith.constant 0.000000e+00 : f32
      %58 = vector.broadcast %cst_30 : f32 to vector<32x128xf32>
      %c0_31 = arith.constant 0 : index
      %c0_32 = arith.constant 0 : index
      %59 = vector.load %arg8[%c0_31, %c0_32] : memref<32x128xf32, #tpu.memory_space<vmem>>, vector<32x128xf32>
      tpu.vector_store %arg8[%c0_31, %c0_32], %58 {strides = array<i32>} : memref<32x128xf32, #tpu.memory_space<vmem>>, vector<32x128xf32>,
    } else {
    }
    %c0 = arith.constant 0 : index
    %c0_1 = arith.constant 0 : index
    %3 = vector.load %arg2[%c0, %c0_1] : memref<32x128xbf16, #tpu.memory_space<vmem>>, vector<32x128xbf16>
    %c0_2 = arith.constant 0 : index
    %c0_3 = arith.constant 0 : index
    %4 = vector.load %arg3[%c0_2, %c0_3] : memref<128x256xbf16, #tpu.memory_space<vmem>>, vector<128x256xbf16>
    %cst = arith.constant dense<0.000000e+00> : vector<32x256xf32>
    %5 = tpu.matmul %3, %4, %cst {dimension_numbers = #tpu.dot_dimension_numbers<[1], [0], [0], [1], [0, 0, 1, 1], [], []>} : vector<32x128xbf16>, vector<128x256xbf16>, vector<32x256xf32> -> vector<32x256xf32>
    %c0_4 = arith.constant 0 : index
    %c0_5 = arith.constant 0 : index
    %6 = vector.load %arg4[%c0_4, %c0_5] : memref<1x256xf32, #tpu.memory_space<vmem>>, vector<1x256xf32>
    %7 = vector.broadcast %6 : vector<1x256xf32> to vector<32x256xf32>
    %8 = arith.addf %5, %7 : vector<32x256xf32>
    %cst_6 = arith.constant 5.000000e-01 : f32
    %9 = vector.broadcast %cst_6 : f32 to vector<32x256xf32>
    %10 = arith.mulf %9, %8 : vector<32x256xf32>
    %cst_7 = arith.constant 0.707106769 : f32
    %11 = vector.broadcast %cst_7 : f32 to vector<32x256xf32>
    %12 = arith.mulf %8, %11 : vector<32x256xf32>
    %cst_8 = arith.constant 0.000000e+00 : f32
    %13 = vector.broadcast %cst_8 : f32 to vector<32x256xf32>
    %14 = arith.cmpf olt, %12, %13 : vector<32x256xf32>
    %cst_9 = arith.constant -1.000000e+00 : f32
    %cst_10 = arith.constant 1.000000e+00 : f32
    %15 = vector.broadcast %cst_9 : f32 to vector<32x256xf32>
    %16 = vector.broadcast %cst_10 : f32 to vector<32x256xf32>
    %17 = arith.select %14, %15, %16 : vector<32x256xi1>, vector<32x256xf32>
    %18 = math.absf %12 : vector<32x256xf32>
    %cst_11 = arith.constant 0.327591091 : f32
    %19 = vector.broadcast %cst_11 : f32 to vector<32x256xf32>
    %20 = arith.mulf %19, %18 : vector<32x256xf32>
    %cst_12 = arith.constant 1.000000e+00 : f32
    %21 = vector.broadcast %cst_12 : f32 to vector<32x256xf32>
    %22 = arith.addf %21, %20 : vector<32x256xf32>
    %23 = tpu.reciprocal %22 {approx = true} : vector<32x256xf32> -> vector<32x256xf32>
    %cst_13 = arith.constant 1.06140542 : f32
    %24 = vector.broadcast %cst_13 : f32 to vector<32x256xf32>
    %25 = arith.mulf %23, %24 : vector<32x256xf32>
    %cst_14 = arith.constant -1.45315206 : f32
    %26 = vector.broadcast %cst_14 : f32 to vector<32x256xf32>
    %27 = arith.addf %26, %25 : vector<32x256xf32>
    %28 = arith.mulf %23, %27 : vector<32x256xf32>
    %cst_15 = arith.constant 1.42141378 : f32
    %29 = vector.broadcast %cst_15 : f32 to vector<32x256xf32>
    %30 = arith.addf %29, %28 : vector<32x256xf32>
    %31 = arith.mulf %23, %30 : vector<32x256xf32>
    %cst_16 = arith.constant -0.284496725 : f32
    %32 = vector.broadcast %cst_16 : f32 to vector<32x256xf32>
    %33 = arith.addf %32, %31 : vector<32x256xf32>
    %34 = arith.mulf %23, %33 : vector<32x256xf32>
    %cst_17 = arith.constant 0.254829586 : f32
    %35 = vector.broadcast %cst_17 : f32 to vector<32x256xf32>
    %36 = arith.addf %35, %34 : vector<32x256xf32>
    %37 = arith.mulf %23, %36 : vector<32x256xf32>
    %cst_18 = arith.constant 0.000000e+00 : f32
    %38 = vector.broadcast %cst_18 : f32 to vector<32x256xf32>
    %39 = arith.subf %38, %18 : vector<32x256xf32>
    %40 = arith.mulf %39, %18 : vector<32x256xf32>
    %41 = math.exp %40 : vector<32x256xf32>
    %42 = arith.mulf %37, %41 : vector<32x256xf32>
    %cst_19 = arith.constant 1.000000e+00 : f32
    %43 = vector.broadcast %cst_19 : f32 to vector<32x256xf32>
    %44 = arith.subf %43, %42 : vector<32x256xf32>
    %45 = arith.mulf %17, %44 : vector<32x256xf32>
    %cst_20 = arith.constant 1.000000e+00 : f32
    %46 = vector.broadcast %cst_20 : f32 to vector<32x256xf32>
    %47 = arith.addf %46, %45 : vector<32x256xf32>
    %48 = arith.mulf %10, %47 : vector<32x256xf32>
    %c0_21 = arith.constant 0 : index
    %c0_22 = arith.constant 0 : index
    %49 = vector.load %arg8[%c0_21, %c0_22] : memref<32x128xf32, #tpu.memory_space<vmem>>, vector<32x128xf32>
    %50 = arith.truncf %48 : vector<32x256xf32> to vector<32x256xbf16>
    %c0_23 = arith.constant 0 : index
    %c0_24 = arith.constant 0 : index
    %51 = vector.load %arg5[%c0_23, %c0_24] : memref<256x128xbf16, #tpu.memory_space<vmem>>, vector<256x128xbf16>
    %cst_25 = arith.constant dense<0.000000e+00> : vector<32x128xf32>
    %52 = tpu.matmul %50, %51, %cst_25 {dimension_numbers = #tpu.dot_dimension_numbers<[1], [0], [0], [1], [0, 0, 1, 1], [], []>} : vector<32x256xbf16>, vector<256x128xbf16>, vector<32x128xf32> -> vector<32x128xf32>
    %53 = arith.addf %49, %52 : vector<32x128xf32>
    %c0_26 = arith.constant 0 : index
    %c0_27 = arith.constant 0 : index
    %54 = vector.load %arg8[%c0_26, %c0_27] : memref<32x128xf32, #tpu.memory_space<vmem>>, vector<32x128xf32>
    tpu.vector_store %arg8[%c0_26, %c0_27], %53 {strides = array<i32>} : memref<32x128xf32, #tpu.memory_space<vmem>>, vector<32x128xf32>,
    %c0_i32_28 = arith.constant 0 : i32
    %55 = arith.cmpi eq, %arg1, %c0_i32_28 : i32
    %56 = arith.extui %55 : i1 to i32
    %c0_i32_29 = arith.constant 0 : i32
    %57 = arith.cmpi ne, %56, %c0_i32_29 : i32
    scf.if %57 {
      %c0_30 = arith.constant 0 : index
      %c0_31 = arith.constant 0 : index
      %58 = vector.load %arg8[%c0_30, %c0_31] : memref<32x128xf32, #tpu.memory_space<vmem>>, vector<32x128xf32>
      %c0_32 = arith.constant 0 : index
      %c0_33 = arith.constant 0 : index
      %59 = vector.load %arg6[%c0_32, %c0_33] : memref<1x128xf32, #tpu.memory_space<vmem>>, vector<1x128xf32>
      %60 = vector.broadcast %59 : vector<1x128xf32> to vector<32x128xf32>
      %61 = arith.addf %58, %60 : vector<32x128xf32>
      %c0_34 = arith.constant 0 : index
      %c0_35 = arith.constant 0 : index
      %62 = vector.load %arg7[%c0_34, %c0_35] : memref<32x128xf32, #tpu.memory_space<vmem>>, vector<32x128xf32>
      tpu.vector_store %arg7[%c0_34, %c0_35], %61 {strides = array<i32>} : memref<32x128xf32, #tpu.memory_space<vmem>>, vector<32x128xf32>,
    } else {
    }
    return
  }
  func.func @transform_0(%arg0: i32, %arg1: i32) -> (i32, i32) {
    %c0_i32 = arith.constant 0 : i32
    %c0_i32_0 = arith.constant 0 : i32
    return %arg0, %c0_i32 : i32, i32
  }
  func.func @transform_1(%arg0: i32, %arg1: i32) -> (i32, i32) {
    %c0_i32 = arith.constant 0 : i32
    %c0_i32_0 = arith.constant 0 : i32
    return %c0_i32, %arg1 : i32, i32
  }
  func.func @transform_2(%arg0: i32, %arg1: i32) -> (i32, i32) {
    %c0_i32 = arith.constant 0 : i32
    %c0_i32_0 = arith.constant 0 : i32
    return %c0_i32, %arg1 : i32, i32
  }
  func.func @transform_3(%arg0: i32, %arg1: i32) -> (i32, i32) {
    %c0_i32 = arith.constant 0 : i32
    %c0_i32_0 = arith.constant 0 : i32
    return %arg1, %c0_i32 : i32, i32
  }
  func.func @transform_4(%arg0: i32, %arg1: i32) -> (i32, i32) {
    %c0_i32 = arith.constant 0 : i32
    %c0_i32_0 = arith.constant 0 : i32
    %c0_i32_1 = arith.constant 0 : i32
    return %c0_i32, %c0_i32_0 : i32, i32
  }
  func.func @transform_5(%arg0: i32, %arg1: i32) -> (i32, i32) {
    %c0_i32 = arith.constant 0 : i32
    %c0_i32_0 = arith.constant 0 : i32
    return %arg0, %c0_i32 : i32, i32
  }
}

</mosaic_0001>

<bundles_post_ra>
// kernel: tpu_custom_call.1
= control target key start
LH: loop header
LB: loop body
LE: loop exit
PB: predicated region body
PF: predicated region fallthrough
CT: control target
= control target key end

     0   :  { %10 = vsyncpa [#allocation4], 0  ;;  %s1231_s0 = inlined_call_operand.hbm [shape: bf16[32,128], index: 0, kind: input, shape index: {}]   ;;  %s1232_s1 = inlined_call_operand.hbm [shape: bf16[128,256], index: 1, kind: input, shape index: {}]   ;;  %s1233_s2 = inlined_call_operand.hbm [shape: f32[1,256], index: 2, kind: input, shape index: {}]   ;;  %s1234_s3 = inlined_call_operand.hbm [shape: bf16[256,128], index: 3, kind: input, shape index: {}]   ;;  %s1235_s4 = inlined_call_operand.vmem [shape: f32[1,128], index: 4, kind: input, shape index: {}]   ;;  %s1236_s5 = inlined_call_operand.hbm [shape: f32[32,128], index: 5, kind: output, shape index: {}]  }
   0x1   :  { %11 = vsyncpa [#allocation7], 0 }
   0x2   :  { %12 = vsyncpa [#allocation10], 0  ;;  %s31_s20 = sshll.u32 %s1232_s1, 4  ;;  %s32_s20 = int_to_ptr.hbm [resolvable:$true] %s31_s20 }
   0x3   :  { %13 = vsyncpa [#allocation5], 0  ;;  %s1017_s21 = smov [#allocation6]   ;;  %s18_s25 = sshll.u32 %s1231_s0, 4  ;;  %s19_s25 = int_to_ptr.hbm [resolvable:$true] %s18_s25 }
   0x4   :  { %s33_s22 = sshll.u32 %s1017_s21, 4  ;;  %s1018_s26 = smov 128   ;;  %s34_s22 = int_to_ptr.vmem [resolvable:$true] %s33_s22 }
   0x5   :  { %s1019_s27 = smov 8   ;;  %s1020_s28 = smov [#allocation3]  }
   0x6   :  { %39 = dma.hbm_to_vmem [thread:$0]  %s32_s20, 2048, %s34_s22, [#allocation7], %s1018_s26, %s1018_s26, %s1019_s27  }
   0x7   :  { %s20_s29 = sshll.u32 %s1020_s28, 4  ;;  %s1021_s1 = smov 64   ;;  %s21_s29 = int_to_ptr.vmem [resolvable:$true] %s20_s29 }
   0x8   :  { %s1022_s30 = smov 4   ;;  %s45_s8 = sshll.u32 %s1233_s2, 4  ;;  %s46_s8 = int_to_ptr.hbm [resolvable:$true] %s45_s8 }
   0x9   :  { %26 = dma.hbm_to_vmem [thread:$0]  %s19_s25, 256, %s21_s29, [#allocation4], %s1021_s1, %s1021_s1, %s1022_s30  }
   0xa   :  { %s1023_s9 = smov [#allocation8]   ;;  %s55_s12 = sshll.u32 %s1234_s3, 4  ;;  %s56_s12 = int_to_ptr.hbm [resolvable:$true] %s55_s12 }
   0xb   :  { %s47_s0 = sshll.u32 %s1023_s9, 4  ;;  %s1024_s13 = smov [#allocation9]   ;;  %s48_s0 = int_to_ptr.vmem [resolvable:$true] %s47_s0 }
   0xc   :  { %50 = dma.hbm_to_vmem [thread:$0]  %s46_s8, 32, %s48_s0, [#allocation7]  }
   0xd   :  { %s57_s14 = sshll.u32 %s1024_s13, 4  ;;  %s58_s14 = int_to_ptr.vmem [resolvable:$true] %s57_s14 }
   0xe   :  { %63 = dma.hbm_to_vmem [thread:$0]  %s56_s12, 2048, %s58_s14, [#allocation10], %s1021_s1, %s1021_s1, %s1022_s30  }
   0xf   :  { %1009 = dma.done.wait [#allocation4], 256  }
  0x10   :  { %1010 = vsyncadd [#allocation4], 4294967040 }
  0x11   :  { %1011 = dma.done.wait [#allocation7], 2080  }
  0x12   :  { %1012 = vsyncadd [#allocation7], 4294965216 }
  0x13   :  { %1013 = dma.done.wait [#allocation10], 2048  }
  0x14   :  { %1014 = vsyncadd [#allocation10], 4294965248  ;;  %v742_v0 = vld [vmem:[#allocation6 + $0x70] sm:$0xf]  ;;  %v829_v1 = vld [vmem:[#allocation6 + $0x74] sm:$0xf0] }
  0x15   :  { %v828_v2 = vld [vmem:[#allocation6 + $0x74] sm:$0xf]  ;;  %v743_v3 = vor.u32 %v829_v1, %v742_v0  ;;  %v744_v4 = vld [vmem:[#allocation6 + $0x78] sm:$0xf0]  ;;  %v734_v5 = vld [vmem:[#allocation6 + $0x60] sm:$0xf] }
  0x16   :  { %v827_v6 = vld [vmem:[#allocation6 + $0x64] sm:$0xf0]  ;;  %v747_v7 = vor.u32 %v828_v2, %v744_v4  ;;  %v826_v8 = vld [vmem:[#allocation6 + $0x64] sm:$0xf]  ;;  %v736_v9 = vld [vmem:[#allocation6 + $0x68] sm:$0xf0] }
  0x17   :  { %208 = vmatpush.bf16.msra.mxu0 %v743_v3  ;;  %v735_v10 = vor.u32 %v827_v6, %v734_v5  ;;  %v739_v11 = vor.u32 %v826_v8, %v736_v9  ;;  %v726_v12 = vld [vmem:[#allocation6 + $0x50] sm:$0xf]  ;;  %v825_v13 = vld [vmem:[#allocation6 + $0x54] sm:$0xf0]  ;;  %v824_v14 = vld [vmem:[#allocation6 + $0x54] sm:$0xf] }
  0x18   :  { %227 = vmatpush.bf16.msra.mxu1 %v747_v7  ;;  %v728_v15 = vld [vmem:[#allocation6 + $0x58] sm:$0xf0]  ;;  %v727_v16 = vor.u32 %v825_v13, %v726_v12  ;;  %v718_v18 = vld [vmem:[#allocation6 + $0x40] sm:$0xf]  ;;  %v823_v19 = vld [vmem:[#allocation6 + $0x44] sm:$0xf0] }
  0x19   :  { %v731_v17 = vor.u32 %v824_v14, %v728_v15  ;;  %v822_v20 = vld [vmem:[#allocation6 + $0x44] sm:$0xf]  ;;  %v720_v21 = vld [vmem:[#allocation6 + $0x48] sm:$0xf0]  ;;  %v719_v22 = vor.u32 %v823_v19, %v718_v18  ;;  %v710_v24 = vld [vmem:[#allocation6 + $0x30] sm:$0xf] }
  0x1a   :  { %v723_v23 = vor.u32 %v822_v20, %v720_v21  ;;  %v821_v25 = vld [vmem:[#allocation6 + $0x34] sm:$0xf0]  ;;  %v820_v26 = vld [vmem:[#allocation6 + $0x34] sm:$0xf]  ;;  %v712_v27 = vld [vmem:[#allocation6 + $0x38] sm:$0xf0] }
  0x1b   :  { %209 = vmatpush.bf16.msra.mxu0 %v735_v10  ;;  %v711_v28 = vor.u32 %v821_v25, %v710_v24  ;;  %v715_v29 = vor.u32 %v820_v26, %v712_v27  ;;  %v702_v30 = vld [vmem:[#allocation6 + $0x20] sm:$0xf]  ;;  %v819_v31 = vld [vmem:[#allocation6 + $0x24] sm:$0xf0]  ;;  %v818_v32 = vld [vmem:[#allocation6 + $0x24] sm:$0xf] }
  0x1c   :  { %228 = vmatpush.bf16.msra.mxu1 %v739_v11  ;;  %v704_v33 = vld [vmem:[#allocation6 + $0x28] sm:$0xf0]  ;;  %v703_v34 = vor.u32 %v819_v31, %v702_v30  ;;  %v694_v36 = vld [vmem:[#allocation6 + $0x10] sm:$0xf]  ;;  %v817_v37 = vld [vmem:[#allocation6 + $0x14] sm:$0xf0] }
  0x1d   :  { %v707_v35 = vor.u32 %v818_v32, %v704_v33  ;;  %v816_v38 = vld [vmem:[#allocation6 + $0x14] sm:$0xf]  ;;  %v696_v39 = vld [vmem:[#allocation6 + $0x18] sm:$0xf0]  ;;  %v695_v40 = vor.u32 %v817_v37, %v694_v36  ;;  %v686_v42 = vld [vmem:[#allocation6] sm:$0xf] }
  0x1e   :  { %v699_v41 = vor.u32 %v816_v38, %v696_v39  ;;  %v815_v43 = vld [vmem:[#allocation6 + $0x4] sm:$0xf0]  ;;  %v814_v44 = vld [vmem:[#allocation6 + $0x4] sm:$0xf]  ;;  %v688_v45 = vld [vmem:[#allocation6 + $0x8] sm:$0xf0] }
  0x1f   :  { %210 = vmatpush.bf16.msra.mxu0 %v727_v16  ;;  %v687_v46 = vor.u32 %v815_v43, %v686_v42  ;;  %v691_v47 = vor.u32 %v814_v44, %v688_v45  ;;  %v812_v48 = vld [vmem:[#allocation3] sm:$0xff]  ;;  %v813_v49 = vld [vmem:[#allocation3 + $0x8] sm:$0xff]  ;;  %v110_v52 = vld [vmem:[#allocation8] sm:$0x3]  ;;  %s1026_s15 = smov [#allocation11]   ;;  %s661_s18 = sshll.u32 %s1236_s5, 4  ;;  %s662_s18 = int_to_ptr.hbm [resolvable:$true] %s661_s18 }
  0x20   :  { %229 = vmatpush.bf16.msra.mxu1 %v731_v17  ;;  %v837_v50 = vld [vmem:[#allocation9 + $0x38] sm:$0xff]  ;;  %v836_v53 = vld [vmem:[#allocation9 + $0x30] sm:$0xff]  ;;  %v1072_v55 = vperm.slane %v110_v52, 0  ;;  %v1074_v56 = vperm.slane %v110_v52, 1  ;;  %v835_v58 = vld [vmem:[#allocation9 + $0x28] sm:$0xff]  ;;  %s659_s16 = sshll.u32 %s1026_s15, 4  ;;  %s660_s16 = int_to_ptr.vmem [resolvable:$true] %s659_s16 }
  0x21   :  { %v845_v51 = vld [vmem:[#allocation9 + $0x78] sm:$0xff]  ;;  %590 = vmatpush.bf16.msra.mxu2 %v837_v50  ;;  %v844_v54 = vld [vmem:[#allocation9 + $0x70] sm:$0xff]  ;;  %v843_v59 = vld [vmem:[#allocation9 + $0x68] sm:$0xff] }
  0x22   :  { %609 = vmatpush.bf16.msra.mxu3 %v845_v51  ;;  %v834_v1 = vld [vmem:[#allocation9 + $0x20] sm:$0xff]  ;;  %v833_v4 = vld [vmem:[#allocation9 + $0x18] sm:$0xff]  ;;  %v832_v13 = vld [vmem:[#allocation9 + $0x10] sm:$0xff] }
  0x23   :  { %211 = vmatpush.bf16.msra.mxu0 %v719_v22  ;;  %v842_v2 = vld [vmem:[#allocation9 + $0x60] sm:$0xff]  ;;  %v841_v5 = vld [vmem:[#allocation9 + $0x58] sm:$0xff]  ;;  %v840_v14 = vld [vmem:[#allocation9 + $0x50] sm:$0xff] }
  0x24   :  { %230 = vmatpush.bf16.msra.mxu1 %v723_v23  ;;  %v831_v22 = vld [vmem:[#allocation9 + $0x8] sm:$0xff]  ;;  %v830_v38 = vld [vmem:[#allocation9] sm:$0xff] }
  0x25   :  { %591 = vmatpush.bf16.msra.mxu2 %v836_v53  ;;  %v839_v23 = vld [vmem:[#allocation9 + $0x48] sm:$0xff]  ;;  %v838_v39 = vld [vmem:[#allocation9 + $0x40] sm:$0xff] }
  0x26   :  { %610 = vmatpush.bf16.msra.mxu3 %v844_v54 }
  0x27   :  { %212 = vmatpush.bf16.msra.mxu0 %v711_v28 }
  0x28   :  { %231 = vmatpush.bf16.msra.mxu1 %v715_v29 }
  0x29   :  { %592 = vmatpush.bf16.msra.mxu2 %v835_v58 }
  0x2a   :  { %611 = vmatpush.bf16.msra.mxu3 %v843_v59 }
  0x2b   :  { %213 = vmatpush.bf16.msra.mxu0 %v703_v34 }
  0x2c   :  { %232 = vmatpush.bf16.msra.mxu1 %v707_v35 }
  0x2d   :  { %593 = vmatpush.bf16.msra.mxu2 %v834_v1 }
  0x2e   :  { %612 = vmatpush.bf16.msra.mxu3 %v842_v2 }
  0x2f   :  { %214 = vmatpush.bf16.msra.mxu0 %v695_v40 }
  0x30   :  { %233 = vmatpush.bf16.msra.mxu1 %v699_v41 }
  0x31   :  { %594 = vmatpush.bf16.msra.mxu2 %v833_v4 }
  0x32   :  { %613 = vmatpush.bf16.msra.mxu3 %v841_v5 }
  0x33   :  { %215 = vmatpush.bf16.msra.mxu0 %v687_v46  ;;  %v1025_v46 = vmov 1.0  }
  0x34   :  { %234 = vmatpush.bf16.msra.mxu1 %v691_v47 }
  0x35   :  { %595 = vmatpush.bf16.msra.mxu2 %v832_v13 }
  0x36   :  { %216 = vmatmul.bf16.vlgmr.msra.gmra.mxu0 %v812_v48  ;;  %614 = vmatpush.bf16.msra.mxu3 %v840_v14 }
  0x37   :  { %235 = vmatmul.bf16.vlgmr.msra.gmra.mxu1 %v812_v48 }
  0x39   :  { %596 = vmatpush.bf16.msra.mxu2 %v831_v22 }
  0x3a   :  { %615 = vmatpush.bf16.msra.mxu3 %v839_v23 }
  0x3d   :  { %597 = vmatpush.bf16.msra.mxu2 %v830_v38 }
  0x3e   :  { %616 = vmatpush.bf16.msra.mxu3 %v838_v39 }
  0x46   :  { %221 = vmatmul.bf16.gmra.mxu0 %v813_v49 }
  0x47   :  { %240 = vmatmul.bf16.gmra.mxu1 %v813_v49 }
  0xb3   :  { %v217_v57 = vpop.f32.mrf.mxu0 }
  0xb4   :  { %v218_v60 = vadd.f32 %v217_v57, %v1072_v55  ;;  %v236_v61 = vpop.f32.mrf.mxu1 }
  0xb5   :  { %v237_v62 = vadd.f32 %v236_v61, %v1074_v56 }
  0xb6   :  { %v254_v63 = vmul.f32 0.70710677, %v218_v60  ;;  %v1091_v31 = vmul.f32 0.5, %v218_v60 }
  0xb7   :  { %v1078_v0 = vmul.f32 0.70710677, %v237_v62  ;;  %v1093_v32 = vmul.f32 0.5, %v237_v62 }
  0xb8   :  { %v278_v3 = vand.u32 2147483647, %v254_v63  ;;  %vm262_vm0 = vcmp.lt.f32.partialorder %v254_v63, 0.0 }
  0xb9   :  { %v279_v7 = vand.u32 2147483647, %v1078_v0  ;;  %vm263_vm1 = vcmp.lt.f32.partialorder %v1078_v0, 0.0  ;;  %v1111_v47 = vsel %vm262_vm0, -1.0, %v1025_v46 }
  0xba   :  { %v286_v6 = vmul.f32 0.3275911, %v278_v3  ;;  %v382_v16 = vsub.f32 0.0, %v278_v3  ;;  %v1115_v51 = vsel %vm263_vm1, -1.0, %v1025_v46 }
  0xbb   :  { %v219_v8 = vpop.f32.mrf.mxu0  ;;  %v287_v17 = vmul.f32 0.3275911, %v279_v7  ;;  %v383_v18 = vsub.f32 0.0, %v279_v7 }
  0xbc   :  { %v294_v9 = vadd.f32 1.0, %v286_v6  ;;  %v220_v10 = vadd.f32 %v219_v8, %v1072_v55  ;;  %v238_v11 = vpop.f32.mrf.mxu1  ;;  %v390_v25 = vmul.f32 %v382_v16, %v278_v3 }
  0xbd   :  { %v239_v12 = vadd.f32 %v238_v11, %v1074_v56  ;;  %v295_v26 = vadd.f32 1.0, %v287_v17  ;;  %v391_v27 = vmul.f32 %v383_v18, %v279_v7 }
  0xbe   :  { %857 = vrcp.f32 %v294_v9  ;;  %v1083_v15 = vmul.f32 0.70710677, %v220_v10  ;;  %v398_v43 = vmul.f32 1.442695, %v390_v25  ;;  %v1117_v52 = vmul.f32 0.5, %v220_v10 }
  0xbf   :  { %v1085_v19 = vmul.f32 0.70710677, %v239_v12  ;;  %v400_v44 = vmul.f32 1.442695, %v391_v27  ;;  %v1120_v57 = vmul.f32 0.5, %v239_v12 }
  0xc0   :  { %v280_v20 = vand.u32 2147483647, %v1083_v15  ;;  %vm264_vm2 = vcmp.lt.f32.partialorder %v1083_v15, 0.0 }
  0xc1   :  { %v281_v21 = vand.u32 2147483647, %v1085_v19  ;;  %vm265_vm3 = vcmp.lt.f32.partialorder %v1085_v19, 0.0 }
  0xc2   :  { %v288_v24 = vmul.f32 0.3275911, %v280_v20  ;;  %v384_v36 = vsub.f32 0.0, %v280_v20  ;;  %v1152_v19 = vsel %vm265_vm3, -1.0, %v1025_v46 }
  0xc3   :  { %v289_v28 = vmul.f32 0.3275911, %v281_v21  ;;  %v222_v29 = vpop.f32.mrf.mxu0  ;;  %v385_v48 = vsub.f32 0.0, %v281_v21 }
  0xc4   :  { %v1089_v30 = vpop.eup %857  ;;  %v296_v33 = vadd.f32 1.0, %v288_v24  ;;  %v1096_v34 = vadd.f32 %v222_v29, %v1072_v55  ;;  %v241_v35 = vpop.f32.mrf.mxu1  ;;  %v392_v53 = vmul.f32 %v384_v36, %v280_v20 }
  0xc5   :  { %v1099_v37 = vadd.f32 %v241_v35, %v1074_v56  ;;  %v310_v40 = vmul.f32 1.0614054, %v1089_v30  ;;  %v297_v41 = vadd.f32 1.0, %v289_v28  ;;  %v393_v0 = vmul.f32 %v385_v48, %v281_v21 }
  0xc6   :  { %859 = vrcp.f32 %v296_v33  ;;  %v1104_v42 = vmul.f32 0.70710677, %v1096_v34  ;;  %v402_v5 = vmul.f32 1.442695, %v392_v53 }
  0xc7   :  { %861 = vrcp.f32 %v295_v26  ;;  %v1107_v45 = vmul.f32 0.70710677, %v1099_v37  ;;  %v318_v50 = vadd.f32 -1.4531521, %v310_v40  ;;  %v404_v15 = vmul.f32 1.442695, %v393_v0 }
  0xc8   :  { %v282_v49 = vand.u32 2147483647, %v1104_v42  ;;  %863 = vrcp.f32 %v297_v41  ;;  %vm266_vm4 = vcmp.lt.f32.partialorder %v1104_v42, 0.0 }
  0xc9   :  { %v283_v54 = vand.u32 2147483647, %v1107_v45  ;;  %865 = vpow2.f32 %v398_v43  ;;  %v326_v62 = vmul.f32 %v1089_v30, %v318_v50  ;;  %vm267_vm5 = vcmp.lt.f32.partialorder %v1107_v45, 0.0 }
  0xca   :  { %v290_v58 = vmul.f32 0.3275911, %v282_v49  ;;  %v386_v59 = vsub.f32 0.0, %v282_v49  ;;  %867 = vpow2.f32 %v400_v44 }
  0xcb   :  { %v291_v60 = vmul.f32 0.3275911, %v283_v54  ;;  %v224_v61 = vpop.f32.mrf.mxu0  ;;  %v387_v10 = vsub.f32 0.0, %v283_v54 }
  0xcc   :  { %v1124_v63 = vpop.eup %859  ;;  %v298_v1 = vadd.f32 1.0, %v290_v58  ;;  %v1127_v2 = vadd.f32 %v224_v61, %v1072_v55  ;;  %v243_v3 = vpop.f32.mrf.mxu1  ;;  %v394_v9 = vmul.f32 %v386_v59, %v282_v49  ;;  %v1142_v55 = vsel %vm264_vm2, -1.0, %v1025_v46 }
  0xcd   :  { %v1129_v4 = vpop.eup %861  ;;  %v299_v6 = vadd.f32 1.0, %v291_v60  ;;  %v1132_v7 = vadd.f32 %v243_v3, %v1074_v56  ;;  %v312_v8 = vmul.f32 1.0614054, %v1124_v63  ;;  %v334_v56 = vadd.f32 1.4214138, %v326_v62 }
  0xce   :  { %v1137_v11 = vmul.f32 0.70710677, %v1127_v2  ;;  %869 = vrcp.f32 %v298_v1  ;;  %v1147_v13 = vpop.eup %863  ;;  %v311_v17 = vmul.f32 1.0614054, %v1129_v4  ;;  %v406_v22 = vmul.f32 1.442695, %v394_v9 }
  0xcf   :  { %v1145_v12 = vmul.f32 0.70710677, %v1132_v7  ;;  %871 = vrcp.f32 %v299_v6  ;;  %v320_v16 = vadd.f32 -1.4531521, %v312_v8  ;;  %v866_v18 = vpop.eup %865  ;;  %v395_v23 = vmul.f32 %v387_v10, %v283_v54 }
  0xd0   :  { %v284_v14 = vand.u32 2147483647, %v1137_v11  ;;  %873 = vpow2.f32 %v402_v5  ;;  %v1155_v21 = vpop.eup %867  ;;  %v342_v28 = vmul.f32 %v1089_v30, %v334_v56  ;;  %v313_v29 = vmul.f32 1.0614054, %v1147_v13 }
  0xd1   :  { %v285_v20 = vand.u32 2147483647, %v1145_v12  ;;  %v328_v25 = vmul.f32 %v1124_v63, %v320_v16  ;;  %v319_v38 = vadd.f32 -1.4531521, %v311_v17  ;;  %875 = vpow2.f32 %v404_v15 }
  0xd2   :  { %v292_v24 = vmul.f32 0.3275911, %v284_v14  ;;  %v388_v26 = vsub.f32 0.0, %v284_v14  ;;  %v350_v41 = vadd.f32 -0.28449672, %v342_v28  ;;  %vm268_vm6 = vcmp.lt.f32.partialorder %v1137_v11, 0.0 }
  0xd3   :  { %v293_v27 = vmul.f32 0.3275911, %v285_v20  ;;  %v389_v35 = vsub.f32 0.0, %v285_v20  ;;  %v336_v36 = vadd.f32 1.4214138, %v328_v25  ;;  %v327_v50 = vmul.f32 %v1129_v4, %v319_v38 }
  0xd4   :  { %v300_v33 = vadd.f32 1.0, %v292_v24  ;;  %v1160_v39 = vpop.eup %869  ;;  %v321_v43 = vadd.f32 -1.4531521, %v313_v29  ;;  %v408_v48 = vmul.f32 1.442695, %v395_v23  ;;  %v396_v54 = vmul.f32 %v388_v26, %v284_v14 }
  0xd5   :  { %v301_v40 = vadd.f32 1.0, %v293_v27  ;;  %v1162_v44 = vpop.eup %871  ;;  %v344_v49 = vmul.f32 %v1124_v63, %v336_v36  ;;  %v358_v58 = vmul.f32 %v1089_v30, %v350_v41  ;;  %v397_v60 = vmul.f32 %v389_v35, %v285_v20 }
  0xd6   :  { %877 = vrcp.f32 %v300_v33  ;;  %v874_v53 = vpop.eup %873  ;;  %v329_v59 = vmul.f32 %v1147_v13, %v321_v43  ;;  %v335_v62 = vadd.f32 1.4214138, %v327_v50  ;;  %v314_v0 = vmul.f32 1.0614054, %v1160_v39 }
  0xd7   :  { %879 = vrcp.f32 %v301_v40  ;;  %v352_v61 = vadd.f32 -0.28449672, %v344_v49  ;;  %v366_v1 = vadd.f32 0.2548296, %v358_v58  ;;  %v315_v5 = vmul.f32 1.0614054, %v1162_v44  ;;  %v876_v10 = vpop.eup %875 }
  0xd8   :  { %881 = vpow2.f32 %v406_v22  ;;  %v337_v3 = vadd.f32 1.4214138, %v329_v59  ;;  %v343_v8 = vmul.f32 %v1129_v4, %v335_v62  ;;  %v322_v9 = vadd.f32 -1.4531521, %v314_v0 }
  0xd9   :  { %883 = vpow2.f32 %v408_v48  ;;  %v360_v6 = vmul.f32 %v1124_v63, %v352_v61  ;;  %v410_v56 = vmul.f32 1.442695, %v396_v54  ;;  %v374_v14 = vmul.f32 %v1089_v30, %v366_v1 }
  0xda   :  { %v345_v16 = vmul.f32 %v1147_v13, %v337_v3  ;;  %v323_v17 = vadd.f32 -1.4531521, %v315_v5  ;;  %v412_v20 = vmul.f32 1.442695, %v397_v60  ;;  %v351_v23 = vadd.f32 -0.28449672, %v343_v8 }
  0xdb   :  { %v368_v22 = vadd.f32 0.2548296, %v360_v6  ;;  %v330_v24 = vmul.f32 %v1160_v39, %v322_v9  ;;  %v414_v26 = vmul.f32 %v866_v18, %v374_v14  ;;  %885 = vpow2.f32 %v410_v56 }
  0xdc   :  { %v1174_v15 = vpop.eup %877  ;;  %v353_v27 = vadd.f32 -0.28449672, %v345_v16  ;;  %v331_v29 = vmul.f32 %v1162_v44, %v323_v17  ;;  %v359_v33 = vmul.f32 %v1129_v4, %v351_v23  ;;  %887 = vpow2.f32 %v412_v20 }
  0xdd   :  { %v1177_v25 = vpop.eup %879  ;;  %v316_v28 = vmul.f32 1.0614054, %v1174_v15  ;;  %v376_v30 = vmul.f32 %v1124_v63, %v368_v22  ;;  %v338_v35 = vadd.f32 1.4214138, %v330_v24  ;;  %v422_v40 = vsub.f32 1.0, %v414_v26 }
  0xde   :  { %v317_v36 = vmul.f32 1.0614054, %v1177_v25  ;;  %v882_v38 = vpop.eup %881  ;;  %v361_v41 = vmul.f32 %v1147_v13, %v353_v27  ;;  %v339_v48 = vadd.f32 1.4214138, %v331_v29  ;;  %v367_v50 = vadd.f32 0.2548296, %v359_v33 }
  0xdf   :  { %v324_v43 = vadd.f32 -1.4531521, %v316_v28  ;;  %v884_v49 = vpop.eup %883  ;;  %v416_v18 = vmul.f32 %v874_v53, %v376_v30  ;;  %v346_v54 = vmul.f32 %v1160_v39, %v338_v35  ;;  %v430_v59 = vmul.f32 %v422_v40, %v1111_v47 }
  0xe0   :  { %v325_v58 = vadd.f32 -1.4531521, %v317_v36  ;;  %v369_v63 = vadd.f32 0.2548296, %v361_v41  ;;  %v347_v61 = vmul.f32 %v1162_v44, %v339_v48  ;;  %v375_v0 = vmul.f32 %v1129_v4, %v367_v50 }
  0xe1   :  { %v332_v60 = vmul.f32 %v1174_v15, %v324_v43  ;;  %v424_v62 = vsub.f32 1.0, %v416_v18  ;;  %v354_v1 = vadd.f32 -0.28449672, %v346_v54  ;;  %v438_v5 = vadd.f32 1.0, %v430_v59  ;;  %v886_v48 = vpop.eup %885 }
  0xe2   :  { %v333_v3 = vmul.f32 %v1177_v25, %v325_v58  ;;  %v377_v53 = vmul.f32 %v1147_v13, %v369_v63  ;;  %v355_v8 = vadd.f32 -0.28449672, %v347_v61  ;;  %v415_v47 = vmul.f32 %v1155_v21, %v375_v0 }
  0xe3   :  { %v340_v6 = vadd.f32 1.4214138, %v332_v60  ;;  %v432_v9 = vmul.f32 %v424_v62, %v1142_v55  ;;  %v362_v14 = vmul.f32 %v1160_v39, %v354_v1  ;;  %v446_v27 = vmul.f32 %v438_v5, %v1091_v31 }
  0xe4   :  { %v341_v16 = vadd.f32 1.4214138, %v333_v3  ;;  %v417_v17 = vmul.f32 %v876_v10, %v377_v53  ;;  %v363_v4 = vmul.f32 %v1162_v44, %v355_v8  ;;  %v423_v24 = vsub.f32 1.0, %v415_v47 }
  0xe5   :  { %v348_v22 = vmul.f32 %v1174_v15, %v340_v6  ;;  %v440_v23 = vadd.f32 1.0, %v432_v9  ;;  %v370_v26 = vadd.f32 0.2548296, %v362_v14  ;;  %v274_v54 = vsel %vm266_vm4, -1.0, %v1025_v46 }
  0xe6   :  { %v349_v13 = vmul.f32 %v1177_v25, %v341_v16  ;;  %v425_v28 = vsub.f32 1.0, %v417_v17  ;;  %v371_v29 = vadd.f32 0.2548296, %v363_v4  ;;  %v431_v30 = vmul.f32 %v423_v24, %v1115_v51 }
  0xe7   :  { %v356_v55 = vadd.f32 -0.28449672, %v348_v22  ;;  %v448_v21 = vmul.f32 %v440_v23, %v1117_v52  ;;  %v378_v10 = vmul.f32 %v1160_v39, %v370_v26  ;;  %vm269_vm7 = vcmp.lt.f32.partialorder %v1145_v12, 0.0 }
  0xe8   :  { %v357_v56 = vadd.f32 -0.28449672, %v349_v13  ;;  %v433_v33 = vmul.f32 %v425_v28, %v1152_v19  ;;  %v379_v36 = vmul.f32 %v1162_v44, %v371_v29  ;;  %v439_v41 = vadd.f32 1.0, %v431_v30 }
  0xe9   :  { %v364_v35 = vmul.f32 %v1174_v15, %v356_v55  ;;  %v458_v40 = vpack.c.bf16 %v448_v21, %v446_v27  ;;  %v418_v31 = vmul.f32 %v882_v38, %v378_v10  ;;  %v888_v38 = vpop.eup %887  ;;  %v276_v60 = vsel %vm268_vm6, -1.0, %v1025_v46 }
  0xea   :  { %v365_v43 = vmul.f32 %v1177_v25, %v357_v56  ;;  %v441_v52 = vadd.f32 1.0, %v433_v33  ;;  %v419_v18 = vmul.f32 %v884_v49, %v379_v36  ;;  %v447_v19 = vmul.f32 %v439_v41, %v1093_v32 }
  0xeb   :  { %v372_v51 = vadd.f32 0.2548296, %v364_v35  ;;  %598 = vmatmul.bf16.vlgmr.msra.gmra.mxu2 %v458_v40  ;;  %v426_v39 = vsub.f32 1.0, %v418_v31  ;;  %v277_v45 = vsel %vm269_vm7, -1.0, %v1025_v46  ;;  %v250_v1 = vmul.f32 0.5, %v1096_v34 }
  0xec   :  { %v373_v20 = vadd.f32 0.2548296, %v365_v43  ;;  %v449_v50 = vmul.f32 %v441_v52, %v1120_v57  ;;  %v427_v63 = vsub.f32 1.0, %v419_v18  ;;  %v252_v3 = vmul.f32 0.5, %v1127_v2  ;;  %v856_v34 = vld [vmem:[%s1235_s4] ss:$0 sm:$0xff] }
  0xed   :  { %v380_v44 = vmul.f32 %v1174_v15, %v372_v51  ;;  %v434_v59 = vmul.f32 %v426_v39, %v274_v54  ;;  %v275_v15 = vsel %vm267_vm5, -1.0, %v1025_v46  ;;  %v253_v53 = vmul.f32 0.5, %v1132_v7 }
  0xee   :  { %v381_v42 = vmul.f32 %v1177_v25, %v373_v20  ;;  %v459_v58 = vpack.c.bf16 %v449_v50, %v447_v19  ;;  %v435_v25 = vmul.f32 %v427_v63, %v275_v15  ;;  %v251_v47 = vmul.f32 0.5, %v1099_v37 }
  0xef   :  { %v420_v49 = vmul.f32 %v886_v48, %v380_v44  ;;  %v442_v62 = vadd.f32 1.0, %v434_v59 }
  0xf0   :  { %v421_v32 = vmul.f32 %v888_v38, %v381_v42  ;;  %617 = vmatmul.bf16.vlgmr.msra.gmra.mxu3 %v459_v58  ;;  %v443_v9 = vadd.f32 1.0, %v435_v25 }
  0xf1   :  { %v428_v57 = vsub.f32 1.0, %v420_v49  ;;  %v450_v6 = vmul.f32 %v442_v62, %v250_v1 }
  0xf2   :  { %v429_v61 = vsub.f32 1.0, %v421_v32  ;;  %v451_v46 = vmul.f32 %v443_v9, %v251_v47 }
  0xf3   :  { %v436_v11 = vmul.f32 %v428_v57, %v276_v60 }
  0xf4   :  { %v437_v0 = vmul.f32 %v429_v61, %v277_v45 }
  0xf5   :  { %v444_v5 = vadd.f32 1.0, %v436_v11 }
  0xf6   :  { %v445_v12 = vadd.f32 1.0, %v437_v0 }
  0xf7   :  { %v452_v8 = vmul.f32 %v444_v5, %v252_v3 }
  0xf8   :  { %v453_v16 = vmul.f32 %v445_v12, %v253_v53 }
  0xf9   :  { %v460_v14 = vpack.c.bf16 %v452_v8, %v450_v6 }
  0xfa   :  { %v461_v17 = vpack.c.bf16 %v453_v16, %v451_v46 }
  0xfb   :  { %603 = vmatmul.bf16.gmra.mxu2 %v460_v14 }
 0x100   :  { %622 = vmatmul.bf16.gmra.mxu3 %v461_v17 }
 0x16e   :  { %v599_v22 = vpop.f32.mrf.mxu2 }
 0x173   :  { %v618_v2 = vpop.f32.mrf.mxu3 }
 0x174   :  { %v619_v4 = vadd.f32 %v618_v2, %v599_v22 }
 0x176   :  { %v647_v23 = vadd.f32 %v856_v34, %v619_v4  ;;  %v601_v7 = vpop.f32.mrf.mxu2 }
 0x178   :  { %651 = vst [vmem:[#allocation11] sm:$0xff] %v647_v23 }
 0x17b   :  { %v620_v24 = vpop.f32.mrf.mxu3 }
 0x17c   :  { %v621_v26 = vadd.f32 %v620_v24, %v601_v7 }
 0x17e   :  { %v648_v13 = vadd.f32 %v856_v34, %v621_v26  ;;  %v604_v37 = vpop.f32.mrf.mxu2 }
 0x180   :  { %652 = vst [vmem:[#allocation11 + $0x8] sm:$0xff] %v648_v13 }
 0x183   :  { %v623_v27 = vpop.f32.mrf.mxu3 }
 0x184   :  { %v624_v28 = vadd.f32 %v623_v27, %v604_v37 }
 0x186   :  { %v649_v55 = vadd.f32 %v856_v34, %v624_v28  ;;  %v606_v29 = vpop.f32.mrf.mxu2 }
 0x188   :  { %653 = vst [vmem:[#allocation11 + $0x10] sm:$0xff] %v649_v55 }
 0x18b   :  { %v625_v21 = vpop.f32.mrf.mxu3 }
 0x18c   :  { %v626_v30 = vadd.f32 %v625_v21, %v606_v29 }
 0x18e   :  { %v650_v10 = vadd.f32 %v856_v34, %v626_v30 }
 0x190   :  { %654 = vst [vmem:[#allocation11 + $0x18] sm:$0xff] %v650_v10 }
 0x191   :  { %667 = dma.vmem_to_hbm [thread:$0]  %s660_s16, 512, %s662_s18, [#allocation5], %s1018_s26, %s1018_s26, %s1019_s27  }
 0x192   :  { %1015 = dma.done.wait [#allocation5], 512  }
 0x193   :  { %1016 = vsyncadd [#allocation5], 4294966784 }
 0x194   :  { %672 = vsyncpa [#allocation4], 1 }
 0x195   :  { %673 = vsyncpa [#allocation7], 1 }
 0x196   :  { %674 = vsyncpa [#allocation10], 1 }
 0x197   :  { %675 = vsyncpa [#allocation5], 1 }

</bundles_post_ra>
